<compile_context>
chip_gen: v7x
topology: tpu7x:2x2x1
jax: 0.10.0
libtpu: 0.0.40
codegen_flags: <defaults>
</compile_context>

<pallas_src>
import jax
import jax.numpy as jnp
from jax import lax
from jax.experimental import pallas as pl
from jax.experimental.pallas import tpu as pltpu

GAMMA = 1.5
ALPHA = 0.25
LANES = 128


def _qfocal_math(pred, true, gamma, alpha):
    """Fused elementwise QFocal loss (pure JAX) — small-n fast path & reference."""
    x = pred.astype(jnp.float32)
    t = true.astype(jnp.float32)
    bce = jnp.maximum(x, 0.0) - x * t + jnp.log1p(jnp.exp(-jnp.abs(x)))
    p = jax.nn.sigmoid(x)
    af = t * alpha + (1.0 - t) * (1.0 - alpha)
    mf = jnp.abs(t - p) ** gamma
    return bce * af * mf


def qfocal_loss_ref(pred, true, gamma=GAMMA, alpha=ALPHA):
    """Pure-JAX reference mirroring the PyTorch forward (reduction='mean')."""
    return jnp.mean(_qfocal_math(pred, true, gamma, alpha))


def _make_kernel(steps, chunks_blk, sub, n_valid, gamma, alpha):
    """Build the per-tile kernel; all tiling params / valid count are static."""
    chunk = sub * LANES
    blk_elems = chunks_blk * chunk

    def kernel(pred_ref, true_ref, out_ref):
        i = pl.program_id(0)          # partition (TensorCore) axis
        j = pl.program_id(1)          # streaming / reduction axis

        # out_ref's block index is constant over j -> stays VMEM resident;
        # accumulate straight into it (no scratch accumulator needed).
        @pl.when(j == 0)
        def _():
            out_ref[...] = jnp.zeros_like(out_ref)

        x = pred_ref[...].astype(jnp.float32)   # (chunks_blk, sub, 128)
        t = true_ref[...].astype(jnp.float32)

        # Shared transcendental: e = exp(-|x|) feeds stable BCE and sigmoid.
        e = jnp.exp(-jnp.abs(x))

        # BCEWithLogitsLoss(reduction='none'): max(x,0) - x*t + log1p(exp(-|x|))
        bce = jnp.maximum(x, 0.0) - x * t + jnp.log1p(e)

        # sigmoid(x) from the same e: r = 1/(1+e); approx EUP recip + one
        # Newton step (pure VPU) restores full f32 accuracy.
        a = 1.0 + e
        r = pl.reciprocal(a, approx=True)
        r = r * (2.0 - a * r)
        pred_prob = jnp.where(x >= 0.0, r, e * r)

        # Folded alpha factor: t*alpha + (1-t)*(1-alpha) == (1-a) + t*(2a-1).
        alpha_factor = (1.0 - alpha) + t * (2.0 * alpha - 1.0)

        d = jnp.abs(t - pred_prob)
        if gamma == 1.5:
            modulating_factor = d * jnp.sqrt(d)   # d**1.5 without exp/log
        else:
            modulating_factor = d ** gamma

        loss = bce * alpha_factor * modulating_factor

        # ---- masked / unmasked partial reduction -------------------------
        # Logical (unclamped) block index: the index_map clamps to stay in
        # bounds, but masking uses the logical offset so clamped / duplicated
        # blocks and the ragged tail contribute exactly zero.
        blk = i * steps + j
        base = blk * blk_elems                 # element offset of this block
        is_full = base + blk_elems <= n_valid  # fully-valid block?

        @pl.when(is_full)
        def _():
            out_ref[...] += jnp.sum(loss, axis=0)

        @pl.when(jnp.logical_not(is_full))
        def _():
            c = lax.broadcasted_iota(jnp.int32, loss.shape, 0)
            s = lax.broadcasted_iota(jnp.int32, loss.shape, 1)
            l = lax.broadcasted_iota(jnp.int32, loss.shape, 2)
            local = c * chunk + s * LANES + l
            keep = local < (n_valid - base)
            # jnp.where (select) so any garbage/inf in masked slots is dropped,
            # never multiplied into the sum.
            out_ref[...] += jnp.sum(jnp.where(keep, loss, 0.0), axis=0)

    return kernel


def qfocal_loss(pred, true, *, gamma=GAMMA, alpha=ALPHA, reduction="mean",
                tile_rows=2048, num_partitions=2, min_kernel_elements=262144):
    """QFocalLoss forward. reduction in {'mean','sum','none'} (default 'mean')."""
    assert pred.shape == true.shape
    n = pred.size
    assert n > 0

    if reduction == "none":
        # Purely elementwise -> XLA fusion is already at roofline; no kernel.
        return _qfocal_math(pred, true, gamma, alpha)

    if n < min_kernel_elements:
        # Tiny per-level losses: skip the kernel launch / slab plumbing.
        loss = _qfocal_math(pred, true, gamma, alpha)
        total = jnp.sum(loss)
        return total / n if reduction == "mean" else total

    # ---- build lane-dense slab (chunks, sub, 128) -------------------------
    # Sublane granule depends on the narrowest streamed dtype so sub-f32
    # inputs stay at/above the packed vreg tile (8 f32 / 16 bf16 / 32 int8).
    min_item = min(jnp.dtype(pred.dtype).itemsize, jnp.dtype(true.dtype).itemsize)
    sub = max(8, 8 * (4 // max(min_item, 1)))
    chunk = sub * LANES

    chunks_total = -(-n // chunk)
    n_slab = chunks_total * chunk
    pad = n_slab - n

    pred_flat = pred.reshape(-1)
    true_flat = true.reshape(-1)
    if pad:
        # Only when n % chunk != 0, and pads < one chunk of zeros. Padded
        # slots are masked in-kernel, so the pad value is irrelevant.
        pred_flat = jnp.pad(pred_flat, (0, pad))
        true_flat = jnp.pad(true_flat, (0, pad))

    pred3 = pred_flat.reshape(chunks_total, sub, LANES)
    true3 = true_flat.reshape(chunks_total, sub, LANES)

    # ---- grid / tiling -----------------------------------------------------
    chunks_blk = max(1, min(tile_rows // sub, chunks_total))
    blocks_total = -(-chunks_total // chunks_blk)
    steps = -(-blocks_total // num_partitions)

    def in_map(i, j):
        # Clamp so the DMA block start always stays in bounds; the kernel's
        # masking (driven by the UNclamped logical index) zeroes any
        # duplicated / out-of-range contribution.
        return (jnp.minimum(i * steps + j, blocks_total - 1), 0, 0)

    in_spec = pl.BlockSpec((chunks_blk, sub, LANES), in_map)
    out_spec = pl.BlockSpec((sub, LANES), lambda i, j: (i, 0))

    n_work = num_partitions * steps * chunks_blk * chunk
    itemsize = pred3.dtype.itemsize + true3.dtype.itemsize
    cost = pl.CostEstimate(
        flops=16 * n_work,
        transcendentals=4 * n_work,          # exp, log1p, approx recip, sqrt
        bytes_accessed=n_slab * itemsize + num_partitions * sub * LANES * 4,
    )

    kernel = _make_kernel(steps, chunks_blk, sub, n, gamma, alpha)

    partials = pl.pallas_call(
        kernel,
        out_shape=jax.ShapeDtypeStruct((num_partitions * sub, LANES), jnp.float32),
        grid_spec=pltpu.PrefetchScalarGridSpec(
            num_scalar_prefetch=0,
            grid=(num_partitions, steps),
            in_specs=[in_spec, in_spec],
            out_specs=out_spec,
        ),
        compiler_params=pltpu.CompilerParams(
            dimension_semantics=("parallel", "arbitrary"),
            vmem_limit_bytes=32 * 1024 * 1024,   # headroom for 1 MiB blocks on v5e
        ),
        cost_estimate=cost,
    )(pred3, true3)

    # Collapse the (num_partitions*sub, 128) partial sums once, in XLA glue.
    total = jnp.sum(partials)
    return total / n if reduction == "mean" else total


if __name__ == "__main__":
    key = jax.random.PRNGKey(0)
    k1, k2, k3, k4 = jax.random.split(key, 4)

    # NCHW logits and binary-ish targets, as in YOLO-style usage.
    shape = (2, 4, 16, 16)                      # 2048 elements (multiple of 1024)
    pred = jax.random.normal(k1, shape, dtype=jnp.float32)
    true = jax.random.bernoulli(k2, p=0.3, shape=shape).astype(jnp.float32)

    # Force the Pallas kernel path even at this small size (exercises the
    # no-pad path + the fully-masked extra partition).
    out = jax.block_until_ready(qfocal_loss(pred, true, min_kernel_elements=0))
    ref = qfocal_loss_ref(pred, true)
    assert jnp.allclose(out, ref, rtol=1e-5, atol=1e-6), (out, ref)

    # Ragged size (n % 1024 != 0): exercises the in-kernel tail masking.
    shape2 = (2, 3, 13, 17)                     # 1326 elements
    pred2 = jax.random.normal(k3, shape2, dtype=jnp.float32)
    true2 = jax.random.bernoulli(k4, p=0.3, shape=shape2).astype(jnp.float32)
    out2 = jax.block_until_ready(qfocal_loss(pred2, true2, min_kernel_elements=0))
    ref2 = qfocal_loss_ref(pred2, true2)
    assert jnp.allclose(out2, ref2, rtol=1e-5, atol=1e-6), (out2, ref2)

    # Default call: small-n fast path (fused pure JAX, no kernel launch).
    out3 = jax.block_until_ready(qfocal_loss(pred, true))
    assert jnp.allclose(out3, ref, rtol=1e-5, atol=1e-6), (out3, ref)

    print("KERNEL_OK")
</pallas_src>

<mosaic_0001>
module attributes {stable_mosaic.version = 11 : i64} {
  func.func @kernel(%arg0: i32, %arg1: i32, %arg2: memref<2x8x128xf32, #tpu.memory_space<vmem>>, %arg3: memref<2x8x128xf32, #tpu.memory_space<vmem>>, %arg4: memref<8x128xf32, #tpu.memory_space<vmem>>) attributes {dimension_semantics = [#tpu.dimension_semantics<parallel>, #tpu.dimension_semantics<arbitrary>], iteration_bounds = array<i64: 2, 1>, scalar_prefetch = 0 : i64, scratch_operands = 0 : i64, tpu.core_type = #tpu.core_type<tc>, window_params = [{transform_indices = @transform_0, window_bounds = array<i64: 2, 8, 128>}, {transform_indices = @transform_1, window_bounds = array<i64: 2, 8, 128>}, {transform_indices = @transform_2, window_bounds = array<i64: 8, 128>}]} {
    %c0_i32 = arith.constant 0 : i32
    %0 = arith.cmpi eq, %arg1, %c0_i32 : i32
    %1 = arith.extui %0 : i1 to i32
    %c0_i32_0 = arith.constant 0 : i32
    %2 = arith.cmpi ne, %1, %c0_i32_0 : i32
    scf.if %2 {
      %cst_16 = arith.constant 0.000000e+00 : f32
      %46 = vector.broadcast %cst_16 : f32 to vector<8x128xf32>
      %c0_17 = arith.constant 0 : index
      %c0_18 = arith.constant 0 : index
      %47 = vector.load %arg4[%c0_17, %c0_18] : memref<8x128xf32, #tpu.memory_space<vmem>>, vector<8x128xf32>
      tpu.vector_store %arg4[%c0_17, %c0_18], %46 {strides = array<i32>} : memref<8x128xf32, #tpu.memory_space<vmem>>, vector<8x128xf32>,
    } else {
    }
    %c0 = arith.constant 0 : index
    %c0_1 = arith.constant 0 : index
    %c0_2 = arith.constant 0 : index
    %3 = vector.load %arg2[%c0, %c0_1, %c0_2] : memref<2x8x128xf32, #tpu.memory_space<vmem>>, vector<2x8x128xf32>
    %c0_3 = arith.constant 0 : index
    %c0_4 = arith.constant 0 : index
    %c0_5 = arith.constant 0 : index
    %4 = vector.load %arg3[%c0_3, %c0_4, %c0_5] : memref<2x8x128xf32, #tpu.memory_space<vmem>>, vector<2x8x128xf32>
    %5 = math.absf %3 : vector<2x8x128xf32>
    %cst = arith.constant 0.000000e+00 : f32
    %6 = vector.broadcast %cst : f32 to vector<2x8x128xf32>
    %7 = arith.subf %6, %5 : vector<2x8x128xf32>
    %8 = math.exp %7 : vector<2x8x128xf32>
    %cst_6 = arith.constant 0.000000e+00 : f32
    %9 = vector.broadcast %cst_6 : f32 to vector<2x8x128xf32>
    %10 = arith.maximumf %3, %9 : vector<2x8x128xf32>
    %11 = arith.mulf %3, %4 : vector<2x8x128xf32>
    %12 = arith.subf %10, %11 : vector<2x8x128xf32>
    %13 = math.log1p %8 : vector<2x8x128xf32>
    %14 = arith.addf %12, %13 : vector<2x8x128xf32>
    %cst_7 = arith.constant 1.000000e+00 : f32
    %15 = vector.broadcast %cst_7 : f32 to vector<2x8x128xf32>
    %16 = arith.addf %15, %8 : vector<2x8x128xf32>
    %17 = tpu.reciprocal %16 {approx = true} : vector<2x8x128xf32> -> vector<2x8x128xf32>
    %18 = arith.mulf %16, %17 : vector<2x8x128xf32>
    %cst_8 = arith.constant 2.000000e+00 : f32
    %19 = vector.broadcast %cst_8 : f32 to vector<2x8x128xf32>
    %20 = arith.subf %19, %18 : vector<2x8x128xf32>
    %21 = arith.mulf %17, %20 : vector<2x8x128xf32>
    %cst_9 = arith.constant 0.000000e+00 : f32
    %22 = vector.broadcast %cst_9 : f32 to vector<2x8x128xf32>
    %23 = arith.cmpf oge, %3, %22 : vector<2x8x128xf32>
    %24 = arith.mulf %8, %21 : vector<2x8x128xf32>
    %25 = arith.select %23, %21, %24 : vector<2x8x128xi1>, vector<2x8x128xf32>
    %cst_10 = arith.constant -5.000000e-01 : f32
    %26 = vector.broadcast %cst_10 : f32 to vector<2x8x128xf32>
    %27 = arith.mulf %4, %26 : vector<2x8x128xf32>
    %cst_11 = arith.constant 7.500000e-01 : f32
    %28 = vector.broadcast %cst_11 : f32 to vector<2x8x128xf32>
    %29 = arith.addf %28, %27 : vector<2x8x128xf32>
    %30 = arith.subf %4, %25 : vector<2x8x128xf32>
    %31 = math.absf %30 : vector<2x8x128xf32>
    %32 = math.sqrt %31 : vector<2x8x128xf32>
    %33 = arith.mulf %31, %32 : vector<2x8x128xf32>
    %34 = arith.mulf %14, %29 : vector<2x8x128xf32>
    %35 = arith.mulf %34, %33 : vector<2x8x128xf32>
    %c1_i32 = arith.constant 1 : i32
    %36 = arith.muli %arg0, %c1_i32 : i32
    %37 = arith.addi %36, %arg1 : i32
    %c2048_i32 = arith.constant 2048 : i32
    %38 = arith.muli %37, %c2048_i32 : i32
    %c2048_i32_12 = arith.constant 2048 : i32
    %39 = arith.addi %38, %c2048_i32_12 : i32
    %c2048_i32_13 = arith.constant 2048 : i32
    %40 = arith.cmpi sle, %39, %c2048_i32_13 : i32
    %41 = arith.extui %40 : i1 to i32
    %c0_i32_14 = arith.constant 0 : i32
    %42 = arith.cmpi ne, %41, %c0_i32_14 : i32
    scf.if %42 {
      %c0_16 = arith.constant 0 : index
      %c0_17 = arith.constant 0 : index
      %46 = vector.load %arg4[%c0_16, %c0_17] : memref<8x128xf32, #tpu.memory_space<vmem>>, vector<8x128xf32>
      %cst_18 = arith.constant dense<0.000000e+00> : vector<8x128xf32>
      %47 = vector.multi_reduction <add>, %35, %cst_18 [0] : vector<2x8x128xf32> to vector<8x128xf32>
      %48 = arith.addf %46, %47 : vector<8x128xf32>
      %c0_19 = arith.constant 0 : index
      %c0_20 = arith.constant 0 : index
      %49 = vector.load %arg4[%c0_19, %c0_20] : memref<8x128xf32, #tpu.memory_space<vmem>>, vector<8x128xf32>
      tpu.vector_store %arg4[%c0_19, %c0_20], %48 {strides = array<i32>} : memref<8x128xf32, #tpu.memory_space<vmem>>, vector<8x128xf32>,
    } else {
    }
    %true = arith.constant true
    %43 = arith.xori %40, %true : i1
    %44 = arith.extui %43 : i1 to i32
    %c0_i32_15 = arith.constant 0 : i32
    %45 = arith.cmpi ne, %44, %c0_i32_15 : i32
    scf.if %45 {
      %46 = tpu.iota {dimensions = array<i32: 0>} : vector<2x8x128xi32>
      %47 = tpu.iota {dimensions = array<i32: 1>} : vector<2x8x128xi32>
      %48 = tpu.iota {dimensions = array<i32: 2>} : vector<2x8x128xi32>
      %c1024_i32 = arith.constant 1024 : i32
      %49 = vector.broadcast %c1024_i32 : i32 to vector<2x8x128xi32>
      %50 = arith.muli %46, %49 : vector<2x8x128xi32>
      %c128_i32 = arith.constant 128 : i32
      %51 = vector.broadcast %c128_i32 : i32 to vector<2x8x128xi32>
      %52 = arith.muli %47, %51 : vector<2x8x128xi32>
      %53 = arith.addi %50, %52 : vector<2x8x128xi32>
      %54 = arith.addi %53, %48 : vector<2x8x128xi32>
      %c2048_i32_16 = arith.constant 2048 : i32
      %55 = arith.subi %c2048_i32_16, %38 : i32
      %56 = vector.broadcast %55 : i32 to vector<2x8x128xi32>
      %57 = arith.cmpi slt, %54, %56 : vector<2x8x128xi32>
      %c0_17 = arith.constant 0 : index
      %c0_18 = arith.constant 0 : index
      %58 = vector.load %arg4[%c0_17, %c0_18] : memref<8x128xf32, #tpu.memory_space<vmem>>, vector<8x128xf32>
      %cst_19 = arith.constant 0.000000e+00 : f32
      %59 = vector.broadcast %cst_19 : f32 to vector<2x8x128xf32>
      %60 = arith.select %57, %35, %59 : vector<2x8x128xi1>, vector<2x8x128xf32>
      %cst_20 = arith.constant dense<0.000000e+00> : vector<8x128xf32>
      %61 = vector.multi_reduction <add>, %60, %cst_20 [0] : vector<2x8x128xf32> to vector<8x128xf32>
      %62 = arith.addf %58, %61 : vector<8x128xf32>
      %c0_21 = arith.constant 0 : index
      %c0_22 = arith.constant 0 : index
      %63 = vector.load %arg4[%c0_21, %c0_22] : memref<8x128xf32, #tpu.memory_space<vmem>>, vector<8x128xf32>
      tpu.vector_store %arg4[%c0_21, %c0_22], %62 {strides = array<i32>} : memref<8x128xf32, #tpu.memory_space<vmem>>, vector<8x128xf32>,
    } else {
    }
    return
  }
  func.func @transform_0(%arg0: i32, %arg1: i32) -> (i32, i32, i32) {
    %c1_i32 = arith.constant 1 : i32
    %0 = arith.muli %arg0, %c1_i32 : i32
    %1 = arith.addi %0, %arg1 : i32
    %c0_i32 = arith.constant 0 : i32
    %2 = arith.minsi %1, %c0_i32 : i32
    %c0_i32_0 = arith.constant 0 : i32
    %c0_i32_1 = arith.constant 0 : i32
    %c0_i32_2 = arith.constant 0 : i32
    return %2, %c0_i32_0, %c0_i32_1 : i32, i32, i32
  }
  func.func @transform_1(%arg0: i32, %arg1: i32) -> (i32, i32, i32) {
    %c1_i32 = arith.constant 1 : i32
    %0 = arith.muli %arg0, %c1_i32 : i32
    %1 = arith.addi %0, %arg1 : i32
    %c0_i32 = arith.constant 0 : i32
    %2 = arith.minsi %1, %c0_i32 : i32
    %c0_i32_0 = arith.constant 0 : i32
    %c0_i32_1 = arith.constant 0 : i32
    %c0_i32_2 = arith.constant 0 : i32
    return %2, %c0_i32_0, %c0_i32_1 : i32, i32, i32
  }
  func.func @transform_2(%arg0: i32, %arg1: i32) -> (i32, i32) {
    %c0_i32 = arith.constant 0 : i32
    %c0_i32_0 = arith.constant 0 : i32
    return %arg0, %c0_i32 : i32, i32
  }
}

</mosaic_0001>

<bundles_post_ra>
// kernel: tpu_custom_call.1
= control target key start
LH: loop header
LB: loop body
LE: loop exit
PB: predicated region body
PF: predicated region fallthrough
CT: control target
= control target key end

     0   :  { %7 = vsyncpa [#allocation3], 0  ;;  %s1020_s0 = inlined_call_operand.hbm [shape: f32[2,8,128], index: 0, kind: input, shape index: {}]   ;;  %s1021_s1 = inlined_call_operand.hbm [shape: f32[2,8,128], index: 1, kind: input, shape index: {}]   ;;  %s1022_s2 = inlined_call_operand.hbm [shape: f32[16,128], index: 2, kind: output, shape index: {}]  }
   0x1   :  { %9 = vsyncpa [#allocation3 + $0x1], 0 }
   0x2   :  { %10 = vsyncpa [#allocation6], 0 }
   0x3   :  { %12 = vsyncpa [#allocation6 + $0x1], 0 }
   0x4   :  { %13 = vsyncpa [#allocation4], 0 }
   0x5   :  { %15 = vsyncpa [#allocation4 + $0x1], 0  ;;  %s798_s9 = smov 0   ;;  %s800_s10 = smov 0  }
   0x6   :  { %s802_s11 = smov 0   ;;  %s804_s12 = smov 0  }
   0x7   :  { %s806_s13 = smov 0   ;;  %s808_s14 = smov 0  }
   0x8   :  { %s810_s15 = smov 0   ;;  %s812_s16 = smov 0  }
   0x9 LB: > { %s475_s17 = sadd.s32 4294967295, %s775_s16   ;;  %s476_s18 = sadd.s32 4294967294, %s775_s16   ;;  %s775_s16 = sphi %s812_s16, %s21_s16   ;;  %s771_s15 = sphi %s810_s15, %s1041_s15   ;;  %s767_s14 = sphi %s808_s14, %s1040_s14   ;;  %s763_s13 = sphi %s806_s13, %s1010_s13   ;;  %s759_s12 = sphi %s804_s12, %s1039_s12   ;;  %s755_s11 = sphi %s802_s11, %s1038_s11   ;;  %s751_s10 = sphi %s800_s10, %s1037_s10   ;;  %s747_s9 = sphi %s798_s9, %s1036_s9  }
   0xa   : > { %s33_s19 = sadd.s32 1, %s771_s15  ;;  %p744_p1 = scmp.ne.s32.totalorder %s763_s13, 0 }
   0xb   : > { %p35_p0 = scmp.ge.s32.totalorder %s33_s19, 2  ;;  %p54_p2 = scmp.eq.s32.totalorder %s775_s16, 0 }
   0xc   : > { %p59_p3 = scmp.ne.s32.totalorder %s763_s13, %s759_s12  ;;  %p60_p5 = scmp.eq.s32.totalorder %s475_s17, 0 }
   0xd   : > { %s1043_s19 = smov (%p35_p0, %s33_s19), 0  ;;  %p844_p4 = por %p744_p1, %p54_p2 }
   0xe   : > { %p848_p6 = por %p60_p5, %p59_p3  ;;  %s101_s22 = ssub.s32 %s771_s15, %s1043_s19 }
   0xf   : > { %p102_p7 = scmp.eq.s32.totalorder %s101_s22, 0  ;;  %s104_s23 = sadd.s32 1, %s755_s11 }
  0x10   : > { %s1026_s21 = scalar_select %p848_p6, 1, 0 }
  0x11   : > { %s856_s24 = scalar_select %p102_p7, %s755_s11, %s104_s23  }
  0x12   : > { %p114_p8 = scmp.ne.s32.totalorder %s755_s11, %s751_s10  ;;  %p115_p9 = scmp.eq.s32.totalorder %s475_s17, 1 }
  0x13   : > { %p120_p10 = scmp.ne.s32.totalorder %s751_s10, %s747_s9  ;;  %p121_p11 = scmp.eq.s32.totalorder %s476_s18, 1 }
  0x14   : > { %p862_p12 = por %p115_p9, %p114_p8  ;;  %p515_p1 = scmp.lt.s32.totalorder %s775_s16, 2 }
  0x15   : > { %p867_p0 = por %p121_p11, %p120_p10  ;;  %s777_s27 = smov [#allocation2]  }
  0x16   : > { %s1027_s25 = scalar_select %p862_p12, 1, 0 }
  0x17   : > { %s1028_s26 = scalar_select %p867_p0, 1, 0 }
  0x18   : > { %s155_s28 = sshll.u32 %s777_s27, 4  ;;  %p874_p2 = pnand %p515_p1, %p844_p4  ;;  %s156_s28 = int_to_ptr.vmem [resolvable:$true] %s155_s28 }
  0x19   : > { %s608_s4 = scalar_lea.hbm %s1020_s0, 256 }
  0x1a   : > { %p609_p3 = scmp.ne.s32.totalorder %s1020_s0, %s608_s4  ;;  %p610_p5 = pneg %p874_p2 }
  0x1b   : > { %p615_p8 = scmp.lt.u32.totalorder %s608_s4, %s608_s4  ;;  %p617_p9 = scmp.lt.u32.totalorder %s608_s4, %s1020_s0 }
  0x1c   : > { %p611_p7 = pnand %p610_p5, %p609_p3 }
  0x1d   : > { %p618_p10 = por %p617_p9, %p615_p8 }
  0x1e   : > { %p612_p4 = pneg %p611_p7 }
  0x20   : > { %p619_p11 = pnand %p618_p10, %p612_p4 }
  0x22   : > { %622 = shalt.err (!%p619_p11)
}
  0x23   : > { %s623_s12 = scalar_lea.vmem %s156_s28, 256  ;;  %s630_s17 = scalar_lea.vmem %s156_s28, 512 }
  0x24   : > { %p624_p1 = scmp.ne.s32.totalorder %s156_s28, %s623_s12  ;;  %p631_p12 = scmp.lt.s32.totalorder %s156_s28, %s156_s28 }
  0x25   : > { %p632_p6 = scmp.lt.s32.totalorder %s630_s17, %s623_s12 }
  0x26   : > { %p626_p13 = pnand %p624_p1, %p610_p5 }
  0x27   : > { %p633_p3 = por %p632_p6, %p631_p12 }
  0x28   : > { %p627_p0 = pneg %p626_p13 }
  0x2a   : > { %p634_p7 = pnand %p633_p3, %p627_p0 }
  0x2c   : > { %637 = shalt.err (!%p634_p7)
}
  0x2d   : > { %s778_s18 = smov 128   ;;  %s779_s20 = smov 8  }
  0x2e   : > { %507 = dma.hbm_to_vmem [thread:$0]  (!%p874_p2), %s1020_s0, 256, %s156_s28, [#allocation3], %s778_s18, %s778_s18, %s779_s20  }
  0x2f   : > { %p485_p13 = scmp.ge.s32.totalorder %s775_s16, 1  ;;  %p187_p4 = scmp.lt.s32.totalorder %s775_s16, 3 }
  0x30   : > { %s780_s30 = smov [#allocation5]   ;;  %s638_s6 = scalar_lea.hbm %s1021_s1, 256 }
  0x31   : > { %p905_p8 = pnand %p485_p13, %p187_p4  ;;  %s179_s3 = sshll.u32 %s780_s30, 4  ;;  %s180_s3 = int_to_ptr.vmem [resolvable:$true] %s179_s3 }
  0x32   : > { %p639_p6 = scmp.ne.s32.totalorder %s1021_s1, %s638_s6  ;;  %p645_p9 = scmp.lt.u32.totalorder %s638_s6, %s638_s6 }
  0x33   : > { %s1030_s27 = scalar_select %p905_p8, 1, 0 }
  0x34   : > { %p641_p12 = pnand %p639_p6, %p610_p5  ;;  %p647_p10 = scmp.lt.u32.totalorder %s638_s6, %s1021_s1 }
  0x36   : > { %p642_p0 = pneg %p641_p12  ;;  %p648_p11 = por %p647_p10, %p645_p9 }
  0x38   : > { %p649_p1 = pnand %p648_p11, %p642_p0 }
  0x3a   : > { %652 = shalt.err (!%p649_p1)
}
  0x3b   : > { %s653_s17 = scalar_lea.vmem %s180_s3, 256  ;;  %s660_s22 = scalar_lea.vmem %s180_s3, 512 }
  0x3c   : > { %p654_p3 = scmp.ne.s32.totalorder %s180_s3, %s653_s17  ;;  %p661_p4 = scmp.lt.s32.totalorder %s180_s3, %s180_s3 }
  0x3d   : > { %p662_p8 = scmp.lt.s32.totalorder %s660_s22, %s653_s17 }
  0x3e   : > { %p656_p7 = pnand %p654_p3, %p610_p5 }
  0x3f   : > { %p663_p6 = por %p662_p8, %p661_p4 }
  0x40   : > { %p657_p13 = pneg %p656_p7 }
  0x42   : > { %p664_p12 = pnand %p663_p6, %p657_p13 }
  0x44   : > { %667 = shalt.err (!%p664_p12)
}
  0x45   : > { %510 = dma.hbm_to_vmem [thread:$0]  (!%p874_p2), %s1021_s1, 256, %s180_s3, [#allocation6], %s778_s18, %s778_s18, %s779_s20  }
  0x46   : > { %p1031_p0 = scmp.ne.s32.totalorder %s1030_s27, 0 }
  0x47   : > { %s193_s4 = sand.u32 (!%p1031_p0), 1, %s763_s13   ;;  %p1032_p5 = scmp.ne.s32.totalorder (!%p1031_p0), %s1026_s21, 0 }
  0x48   : > { %191 = sbr.rel (%p1031_p0) target bundleno = 194 (0xc2), region = 28  ;;  %s486_s5 = sshll.u32 (!%p1031_p0), %s193_s4, 4 }
  0x49   : > { %s194_s6 = scalar_lea.sflag (!%p1031_p0), [#allocation3], %s193_s4  ;;  %s197_s7 = scalar_lea.vmem (!%p1031_p0), [#allocation2], %s486_s5 }
  0x4f   : > { %733 = dma.done.wait (%p1032_p5), %s194_s6, 256  }
  0x50   : > { %735 = vsyncadd (%p1032_p5), %s194_s6, 4294967040  ;;  %s203_s29 = scalar_lea.sflag [#allocation6], %s193_s4  ;;  %s939_s8 = scalar_lea.vmem [#allocation5], %s486_s5 }
  0x51   : > { %737 = dma.done.wait (%p1032_p5), %s203_s29, 256  }
  0x52   : > { %739 = vsyncadd (%p1032_p5), %s203_s29, 4294967040  ;;  %s229_s18 = sand.u32 1, %s751_s10   ;;  %s489_s20 = sshll.u32 %s767_s14, 11  ;;  %v781_v0 = vmov 0.0   ;;  %v245_v1 = vld [vmem:[%s197_s7] sm:$0xff]  ;;  %v246_v2 = vld [vmem:[%s197_s7 + $0x8] sm:$0xff] }
  0x53   : > { %s488_s27 = sshll.u32 %s229_s18, 3  ;;  %s951_s3 = sadd.s32 2048, %s489_s20  ;;  %v249_v3 = vand.u32 2147483647, %v245_v1  ;;  %v250_v4 = vand.u32 2147483647, %v246_v2 }
  0x54   : > { %s953_s28 = scalar_lea.vmem [#allocation7], %s488_s27  ;;  %vm293_vm0 = vcmp.ge.f32.partialorder %v245_v1, 0.0  ;;  %v247_v21 = vld [vmem:[%s939_s8] sm:$0xff]  ;;  %vm294_vm1 = vcmp.ge.f32.partialorder %v246_v2, 0.0  ;;  %v248_v23 = vld [vmem:[%s939_s8 + $0x8] sm:$0xff]  ;;  %v257_v39 = vmax.f32 %v245_v1, 0.0 }
  0x55   : > { %244 = vst [vmem:[%s953_s28] sm:$0xff] %v781_v0  ;;  %v251_v5 = vsub.f32 0.0, %v249_v3  ;;  %v252_v6 = vsub.f32 0.0, %v250_v4  ;;  %v259_v40 = vmul.f32 %v247_v21, %v245_v1  ;;  %v258_v41 = vmax.f32 %v246_v2, 0.0  ;;  %p490_p2 = scmp.gt.s32.totalorder %s951_s3, 2048 }
  0x56   : > { %v260_v42 = vmul.f32 %v248_v23, %v246_v2  ;;  %v299_v48 = vmul.f32 -0.5, %v247_v21  ;;  %v300_v51 = vmul.f32 -0.5, %v248_v23 }
  0x57   : > { %v253_v7 = vmul.f32 1.442695, %v251_v5  ;;  %v255_v8 = vmul.f32 1.442695, %v252_v6  ;;  %v261_v47 = vsub.f32 %v257_v39, %v259_v40 }
  0x58   : > { %v262_v49 = vsub.f32 %v258_v41, %v260_v42  ;;  %v301_v54 = vadd.f32 0.75, %v299_v48  ;;  %v302_v57 = vadd.f32 0.75, %v300_v51 }
  0x59   : > { %592 = vpow2.f32 %v253_v7 }
  0x5a   : > { %594 = vpow2.f32 %v255_v8 }
  0x63   : > { %v593_v9 = vpop.eup %592 }
  0x64   : > { %v595_v10 = vpop.eup %594  ;;  %v263_v11 = vadd.f32 1.0, %v593_v9  ;;  %v266_v24 = vmul.f32 -0.5, %v593_v9  ;;  %v269_v34 = vand.u32 2147483647, %v593_v9 }
  0x65   : > { %v272_v12 = vadd.f32 1.0, %v595_v10  ;;  %v275_v26 = vmul.f32 -0.5, %v595_v10  ;;  %v278_v38 = vand.u32 2147483647, %v595_v10 }
  0x66   : > { %596 = vrcp.f32 %v263_v11  ;;  %v267_v31 = vadd.f32 1.0, %v266_v24  ;;  %vm270_vm2 = vcmp.lt.f32.partialorder %v269_v34, 0.0004427343 }
  0x67   : > { %598 = vrcp.f32 %v272_v12  ;;  %v276_v35 = vadd.f32 1.0, %v275_v26  ;;  %vm279_vm3 = vcmp.lt.f32.partialorder %v278_v38, 0.0004427343 }
  0x68   : > { %600 = vlog2.f32 %v263_v11  ;;  %v268_v44 = vmul.f32 %v593_v9, %v267_v31 }
  0x69   : > { %602 = vlog2.f32 %v272_v12  ;;  %v277_v46 = vmul.f32 %v595_v10, %v276_v35 }
  0x70   : > { %v597_v13 = vpop.eup %596 }
  0x71   : > { %v599_v14 = vpop.eup %598  ;;  %v287_v15 = vmul.f32 %v597_v13, %v263_v11 }
  0x72   : > { %v288_v16 = vmul.f32 %v599_v14, %v272_v12  ;;  %v601_v33 = vpop.eup %600 }
  0x73   : > { %v289_v17 = vsub.f32 2.0, %v287_v15  ;;  %v603_v37 = vpop.eup %602  ;;  %v265_v43 = vmul.f32 0.6931472, %v601_v33 }
  0x74   : > { %v290_v18 = vsub.f32 2.0, %v288_v16  ;;  %v274_v45 = vmul.f32 0.6931472, %v603_v37 }
  0x75   : > { %v291_v19 = vmul.f32 %v597_v13, %v289_v17  ;;  %v271_v50 = vsel %vm270_vm2, %v268_v44, %v265_v43 }
  0x76   : > { %v292_v20 = vmul.f32 %v599_v14, %v290_v18  ;;  %v280_v52 = vsel %vm279_vm3, %v277_v46, %v274_v45  ;;  %v281_v53 = vadd.f32 %v271_v50, %v261_v47 }
  0x77   : > { %v295_v22 = vmul.f32 %v593_v9, %v291_v19  ;;  %v282_v56 = vadd.f32 %v280_v52, %v262_v49  ;;  %v334_v9 = vld [vmem:[%s953_s28] sm:$0xff] (!%p490_p2) }
  0x78   : > { %v296_v25 = vmul.f32 %v595_v10, %v292_v20  ;;  %v323_v0 = vmul.f32 %v301_v54, %v281_v53 }
  0x79   : > { %v297_v27 = vsel %vm293_vm0, %v291_v19, %v295_v22  ;;  %v324_v3 = vmul.f32 %v302_v57, %v282_v56 }
  0x7a   : > { %v298_v28 = vsel %vm294_vm1, %v292_v20, %v296_v25  ;;  %v303_v29 = vsub.f32 %v247_v21, %v297_v27 }
  0x7b   : > { %v304_v30 = vsub.f32 %v248_v23, %v298_v28 }
  0x7c   : > { %v305_v32 = vand.u32 2147483647, %v303_v29 }
  0x7d   : > { %v306_v36 = vand.u32 2147483647, %v304_v30 }
  0x7e   : > { %604 = vrsqrt.f32 %v305_v32  ;;  %vm309_vm4 = vcmp.eq.f32.partialorder %v305_v32, inf  ;;  %v312_v58 = vand.u32 2147483648, %v305_v32  ;;  %vm311_vm5 = vcmp.eq.f32.partialorder %v305_v32, 0.0 }
  0x7f   : > { %606 = vrsqrt.f32 %v306_v36  ;;  %vm316_vm6 = vcmp.eq.f32.partialorder %v306_v36, inf  ;;  %v319_v61 = vand.u32 2147483648, %v306_v36  ;;  %vm318_vm7 = vcmp.eq.f32.partialorder %v306_v36, 0.0 }
  0x88   : > { %v605_v55 = vpop.eup %604 }
  0x89   : > { %v607_v59 = vpop.eup %606  ;;  %v308_v60 = vmul.f32 %v605_v55, %v305_v32 }
  0x8a   : > { %v315_v62 = vmul.f32 %v607_v59, %v306_v36  ;;  %333 = sbr.rel (%p490_p2) target bundleno = 151 (0x97), region = 44 }
  0x8b   : > { %v310_v63 = vsel %vm309_vm4, %v305_v32, %v308_v60 }
  0x8c   : > { %v313_v1 = vsel %vm311_vm5, %v312_v58, %v310_v63  ;;  %v317_v2 = vsel %vm316_vm6, %v306_v36, %v315_v62 }
  0x8d   : > { %v320_v4 = vsel %vm318_vm7, %v319_v61, %v317_v2  ;;  %v321_v5 = vmul.f32 %v313_v1, %v305_v32 }
  0x8e   : > { %v322_v6 = vmul.f32 %v320_v4, %v306_v36 }
  0x8f   : > { %v325_v7 = vmul.f32 %v323_v0, %v321_v5 }
  0x90   : > { %v326_v8 = vmul.f32 %v324_v3, %v322_v6 }
  0x92   : > { %v335_v10 = vadd.f32 %v326_v8, %v325_v7 }
  0x94   : > { %v336_v11 = vadd.f32 %v335_v10, %v334_v9 }
  0x96   : > { %337 = vst [vmem:[%s953_s28] sm:$0xff] %v336_v11 }
  0x97 PF: > { %p491_p8 = scmp.le.s32.totalorder %s951_s3, 2048 }
  0x98   : > { %v342_v12 = vlaneseq (!%p491_p8)  ;;  %s350_s21 = ssub.s32 (!%p491_p8), 2048, %s489_s20 }
  0x99   : > { %341 = sbr.rel (%p491_p8) target bundleno = 169 (0xa9), region = 48  ;;  %v351_v16 = vstv (!%p491_p8), %s350_s21 }
  0x9a   : > { %v343_v13 = vshrl.u32 (!%p491_p8), %v342_v12, 7  ;;  %v345_v14 = vand.u32 (!%p491_p8), 127, %v342_v12 }
  0x9c   : > { %v346_v15 = vmul.u32 (!%p491_p8), 128, %v343_v13 }
  0x9d   : > { %v354_v21 = vld [vmem:[%s953_s28] sm:$0xff] (!%p491_p8) }
  0x9e   : > { %v347_v17 = vadd.s32 (!%p491_p8), 1024, %v346_v15  ;;  %v348_v18 = vadd.s32 (!%p491_p8), %v346_v15, %v345_v14 }
  0xa0   : > { %v349_v19 = vadd.s32 %v347_v17, %v345_v14  ;;  %vm352_vm8 = vcmp.lt.s32.totalorder %v348_v18, %v351_v16 }
  0xa1   : > { %v355_v20 = vsel %vm352_vm8, %v325_v7, 0.0 }
  0xa2   : > { %vm353_vm9 = vcmp.lt.s32.totalorder %v349_v19, %v351_v16 }
  0xa3   : > { %v356_v22 = vsel %vm353_vm9, %v326_v8, 0.0 }
  0xa4   : > { %v357_v23 = vadd.f32 %v356_v22, %v355_v20 }
  0xa6   : > { %v358_v24 = vadd.f32 %v357_v23, %v354_v21 }
  0xa8   : > { %359 = vst [vmem:[%s953_s28] sm:$0xff] %v358_v24 }
  0xa9 PF: > { %s493_s12 = sshll.u32 %s767_s14, 7  ;;  %s374_s30 = sshll.u32 %s953_s28, 4  ;;  %s375_s30 = int_to_ptr.vmem [resolvable:$true] %s374_s30 }
  0xaa   : > { %s970_s23 = scalar_lea.hbm %s1022_s2, %s493_s12  ;;  %s361_s4 = scalar_lea.sflag [#allocation4], %s229_s18 }
  0xab   : > { %s668_s5 = scalar_lea.vmem %s375_s30, 128  ;;  %p1033_p10 = scmp.ne.s32.totalorder %s1027_s25, 0 }
  0xac   : > { %p669_p9 = scmp.ne.s32.totalorder %s375_s30, %s668_s5  ;;  %s782_s6 = smov [#allocation7]  }
  0xad   : > { %s672_s7 = sshll.u32 %s782_s6, 4  ;;  %s673_s7 = int_to_ptr.vmem [resolvable:$false] %s672_s7 }
  0xae   : > { %p670_p11 = pnand %p669_p9, %p1033_p10  ;;  %s674_s29 = scalar_lea.vmem %s673_s7, 256 }
  0xaf   : > { %p675_p3 = scmp.lt.s32.totalorder %s375_s30, %s673_s7  ;;  %p676_p7 = scmp.lt.s32.totalorder %s674_s29, %s668_s5 }
  0xb0   : > { %p671_p1 = pneg %p670_p11 }
  0xb1   : > { %p677_p13 = por %p676_p7, %p675_p3 }
  0xb3   : > { %p678_p4 = pnand %p677_p13, %p671_p1 }
  0xb5   : > { %681 = shalt.err (!%p678_p4)
}
  0xb6   : > { %s682_s14 = scalar_lea.hbm %s970_s23, 128  ;;  %s686_s20 = scalar_lea.hbm %s1022_s2, 256 }
  0xb7   : > { %p683_p6 = scmp.ne.s32.totalorder %s970_s23, %s682_s14  ;;  %p687_p5 = scmp.lt.u32.totalorder %s970_s23, %s1022_s2 }
  0xb8   : > { %p688_p2 = scmp.lt.u32.totalorder %s686_s20, %s682_s14  ;;  %p690_p9 = scmp.lt.u32.totalorder %s682_s14, %s970_s23 }
  0xb9   : > { %p684_p12 = pnand %p683_p6, %p1033_p10 }
  0xba   : > { %p689_p8 = por %p688_p2, %p687_p5 }
  0xbb   : > { %p685_p0 = pneg %p684_p12 }
  0xbc   : > { %p691_p11 = por %p690_p9, %p689_p8 }
  0xbe   : > { %p692_p1 = pnand %p691_p11, %p685_p0 }
  0xc0   : > { %695 = shalt.err (!%p692_p1)
}
  0xc1   : > { %502 = dma.vmem_to_hbm [thread:$0]  (%p1033_p10), %s375_s30, 128, %s970_s23, %s361_s4  }
  0xc2 PF: > { %s386_s28 = sand.u32 1, %s747_s9   ;;  %p1034_p3 = scmp.ne.s32.totalorder %s1028_s26, 0 }
  0xc3   : > { %p1035_p7 = scmp.ge.s32.totalorder %s775_s16, 2  ;;  %s387_s21 = scalar_lea.sflag [#allocation4], %s386_s28 }
  0xc5   : > { %p512_p13 = pnand %p1035_p7, %p1034_p3 }
  0xc7   : > { %741 = dma.done.wait (!%p512_p13), %s387_s21, 128  }
  0xc8   : > { %743 = vsyncadd (!%p512_p13), %s387_s21, 4294967168  ;;  %s21_s16 = sadd.s32 1, %s775_s16   ;;  %s1036_s9 = smov %s751_s10 }
  0xc9   : > { %p18_p4 = scmp.ge.s32.totalorder %s21_s16, 4   ;;  %s1037_s10 = smov %s755_s11 }
  0xca   : > { %s1038_s11 = smov %s856_s24  ;;  %s1039_s12 = smov %s763_s13 }
  0xcb   : > { %s1010_s13 = smov 0   ;;  %s1040_s14 = smov %s771_s15 }
  0xcc   : > { %s1041_s15 = smov %s1043_s19  ;;  %20 = sbr.rel (!%p18_p4) target bundleno = 9 (0x9), region = 98 }
  0xd3   :  { %392 = vsyncpa [#allocation3], 1 }
  0xd4   :  { %394 = vsyncpa [#allocation3 + $0x1], 1 }
  0xd5   :  { %395 = vsyncpa [#allocation6], 1 }
  0xd6   :  { %397 = vsyncpa [#allocation6 + $0x1], 1 }
  0xd7   :  { %398 = vsyncpa [#allocation4], 1 }
  0xd8   :  { %400 = vsyncpa [#allocation4 + $0x1], 1 }

</bundles_post_ra>
